<compile_context>
chip_gen: v7x
topology: tpu7x:2x2x1
jax: 0.10.0
libtpu: 0.0.40
codegen_flags: <defaults>
</compile_context>

<pallas_src>
from functools import partial

import jax
import jax.numpy as jnp
from jax.experimental import pallas as pl
from jax.experimental.pallas import tpu as pltpu

THRESHOLD = 1.0  # snntorch default


# --------------------------------------------------------------------------- #
# Kernel
# --------------------------------------------------------------------------- #
def snn_kernel(cur1_ref, w12_ref, consts_ref, out_ref, *, timesteps, beta):
    """One invocation runs the full T-step recurrence for its batch block.

    cur1_ref   : (B, H)  f32   fc1(x) + b1 + vb1   (timestep-invariant)
    w12_ref    : (H, C+O) bf16 fused recurrent/fc2 weight: [:, :H]=V1, [:, C:]=W2
    consts_ref : (O+1, O) f32  rows 0..O-1 = V2, row O = b2 + vb2
    out_ref    : (B, P)  f32   lane-dense spike slab; cols [t*O:(t+1)*O] = spk2_t
    """
    B, H = cur1_ref.shape
    O = consts_ref.shape[1]
    cur2_col = w12_ref.shape[1] - O            # lane offset of the fc2 columns

    # ---------------- loop-invariant reads / broadcasts (hoisted) -------------
    cur1 = cur1_ref[...]                       # (B, H) f32
    w12 = w12_ref[...]                         # (H, cur2_col+O) bf16, read once
    consts = consts_ref[...]                   # (O+1, O) f32
    v2_rows = [jnp.broadcast_to(consts[i:i + 1, :], (B, O)) for i in range(O)]
    bias2 = jnp.broadcast_to(consts[O:O + 1, :], (B, O))

    spk1 = jnp.zeros((B, H), jnp.float32)
    mem1 = jnp.zeros((B, H), jnp.float32)
    spk2 = jnp.zeros((B, O), jnp.float32)
    mem2 = jnp.zeros((B, O), jnp.float32)
    # rec1 = spk1_{t-1} @ V1, carried one step ahead; zero at t=0 (vb1 folded in cur1).
    rec1 = jnp.zeros((B, H), jnp.float32)

    outs = []
    for _ in range(timesteps):                 # static unroll (timesteps is const)
        # ---- RLeaky layer 1 (VPU) ----
        mem1 = beta * mem1 + cur1 + rec1 - spk1 * THRESHOLD
        spk1 = (mem1 > THRESHOLD).astype(jnp.float32)

        # One fused MXU dot: [spk1@V1 | 0 | spk1@W2] (bf16 operands, f32 accumulate).
        # Both result slices below are lane-aligned (lane 0 / lane cur2_col).
        fused = jnp.dot(spk1.astype(jnp.bfloat16), w12,
                        preferred_element_type=jnp.float32)
        rec1 = fused[:, :H]                    # layer-1 recurrent current, NEXT step
        cur2 = fused[:, cur2_col:cur2_col + O]  # fc2 current for THIS step

        # ---- RLeaky layer 2: (B,2)x(2,2) recurrence on the VPU ----
        rec2 = spk2[:, 0:1] * v2_rows[0]
        for i in range(1, O):
            rec2 = rec2 + spk2[:, i:i + 1] * v2_rows[i]
        mem2 = beta * mem2 + cur2 + rec2 + bias2 - spk2 * THRESHOLD
        spk2 = (mem2 > THRESHOLD).astype(jnp.float32)
        outs.append(spk2)

    # Single lane-dense store: pad to the (B, P) slab so the store is unmasked.
    pad = out_ref.shape[1] - timesteps * O
    if pad:
        outs.append(jnp.zeros((B, pad), jnp.float32))
    out_ref[...] = jnp.concatenate(outs, axis=-1)


# --------------------------------------------------------------------------- #
# Param prep (run once per weight set; cache the result across forward calls)
# --------------------------------------------------------------------------- #
def _default_cur2_col(H):
    """Lane offset for the fc2 columns inside the fused weight.

    On 256-wide-MXU chips (v6e/v7x) padding the fc2 columns to the next 128-lane
    boundary removes a per-step cross-lane shift at zero MXU cost. On v5e's
    128-wide MXU that padding would add an extra output column tile per step,
    so keep the packed layout there (and on unknown chips).
    """
    try:
        kind = jax.devices()[0].device_kind.lower()
    except Exception:  # pragma: no cover - defensive
        kind = ""
    if ("v6" in kind) or ("v7" in kind):
        return max(H, ((H + 127) // 128) * 128)
    return H


def snn_prepare(w1, b1, v1, vb1, w2, b2, v2, vb2):
    """Fold biases, fuse V1/W2 into one bf16 weight, pack the tiny layer-2 consts."""
    H = w1.shape[1]
    O = w2.shape[1]
    cur2_col = _default_cur2_col(H)

    bias1 = (b1 + vb1).reshape(1, H).astype(jnp.float32)
    bias2 = (b2 + vb2).reshape(1, O).astype(jnp.float32)

    w12 = jnp.zeros((H, cur2_col + O), jnp.float32)
    w12 = w12.at[:, :H].set(v1.astype(jnp.float32))
    w12 = w12.at[:, cur2_col:].set(w2.astype(jnp.float32))
    w12 = w12.astype(jnp.bfloat16)                      # spikes are 0/1 -> LHS exact

    consts = jnp.zeros((O + 1, O), jnp.float32)
    consts = consts.at[:O, :].set(v2.astype(jnp.float32))   # rows 0..O-1 = V2
    consts = consts.at[O, :].set(bias2.reshape(O))          # row O       = b2 + vb2

    return {"w1": w1.astype(jnp.float32), "bias1": bias1,
            "w12": w12, "consts": consts}


# --------------------------------------------------------------------------- #
# Forward (jitted: fc1 + pallas kernel + output reshape fuse into one executable)
# --------------------------------------------------------------------------- #
@partial(jax.jit, static_argnames=("timesteps", "beta", "batch_block"))
def snn_apply(x, params, *, timesteps, beta, batch_block=None):
    B = x.shape[0]
    H = params["w1"].shape[1]
    O = params["consts"].shape[1]
    T = int(timesteps)

    # fc1 is timestep-invariant: compute once here (exact f32), off the recurrence.
    cur1 = jnp.dot(x.astype(jnp.float32), params["w1"],
                   precision=jax.lax.Precision.HIGHEST) + params["bias1"]

    out_cols = max(128, ((T * O + 127) // 128) * 128)   # lane-dense output slab
    kernel = partial(snn_kernel, timesteps=T, beta=float(beta))

    use_grid = (batch_block is not None and batch_block % 8 == 0
                and B % batch_block == 0 and B // batch_block > 1)

    if use_grid:
        # Batch-sharded path: each grid step (a TensorCore on v7x) runs the full
        # T-step recurrence for its own batch block. Working set per block is a
        # few KB, far below any generation's VMEM limit.
        out_flat = pl.pallas_call(
            kernel,
            out_shape=jax.ShapeDtypeStruct((B, out_cols), jnp.float32),
            grid=(B // batch_block,),
            in_specs=[
                pl.BlockSpec((batch_block, H), lambda i: (i, 0)),
                pl.BlockSpec(tuple(params["w12"].shape), lambda i: (0, 0)),
                pl.BlockSpec(tuple(params["consts"].shape), lambda i: (0, 0)),
            ],
            out_specs=pl.BlockSpec((batch_block, out_cols), lambda i: (i, 0)),
            compiler_params=pltpu.CompilerParams(
                dimension_semantics=("parallel",)),
        )(cur1, params["w12"], params["consts"])
    else:
        # Gridless path (default for small B): everything resident in VMEM.
        vmem = pl.BlockSpec(memory_space=pltpu.MemorySpace.VMEM)
        out_flat = pl.pallas_call(
            kernel,
            out_shape=jax.ShapeDtypeStruct((B, out_cols), jnp.float32),
            in_specs=[vmem, vmem, vmem],
            out_specs=vmem,
        )(cur1, params["w12"], params["consts"])

    # (B, out_cols) slab -> (T, B, O), matching torch.stack(spk_recording).
    spk = out_flat[:, :T * O].reshape(B, T, O)
    return jnp.transpose(spk, (1, 0, 2))


# --------------------------------------------------------------------------- #
# Pure-JAX reference (mirrors the kernel numerics: bf16 V1/W2, f32 elsewhere)
# --------------------------------------------------------------------------- #
def snn_reference(x, w1, b1, v1, vb1, w2, b2, v2, vb2, *, timesteps, beta):
    B = x.shape[0]
    H = w1.shape[1]
    O = w2.shape[1]
    bias1 = (b1 + vb1).reshape(1, H).astype(jnp.float32)
    bias2 = (b2 + vb2).reshape(1, O).astype(jnp.float32)
    cur1 = jnp.dot(x.astype(jnp.float32), w1.astype(jnp.float32),
                   precision=jax.lax.Precision.HIGHEST) + bias1
    v1b = v1.astype(jnp.bfloat16)
    w2b = w2.astype(jnp.bfloat16)
    v2f = v2.astype(jnp.float32)

    spk1 = jnp.zeros((B, H), jnp.float32)
    mem1 = jnp.zeros((B, H), jnp.float32)
    spk2 = jnp.zeros((B, O), jnp.float32)
    mem2 = jnp.zeros((B, O), jnp.float32)
    rec1 = jnp.zeros((B, H), jnp.float32)

    spikes = []
    for _ in range(timesteps):
        mem1 = beta * mem1 + cur1 + rec1 - spk1 * THRESHOLD
        spk1 = (mem1 > THRESHOLD).astype(jnp.float32)
        s1b = spk1.astype(jnp.bfloat16)
        rec1 = jnp.dot(s1b, v1b, preferred_element_type=jnp.float32)
        cur2 = jnp.dot(s1b, w2b, preferred_element_type=jnp.float32)
        rec2 = spk2[:, 0:1] * v2f[0:1, :]
        for i in range(1, O):
            rec2 = rec2 + spk2[:, i:i + 1] * v2f[i:i + 1, :]
        mem2 = beta * mem2 + cur2 + rec2 + bias2 - spk2 * THRESHOLD
        spk2 = (mem2 > THRESHOLD).astype(jnp.float32)
        spikes.append(spk2)
    return jnp.stack(spikes)


# --------------------------------------------------------------------------- #
if __name__ == "__main__":
    # Small, module-consistent shapes: batch=8, 16 input features, hidden=32,
    # 2 output units, 8 timesteps.
    B, D, H, O, T = 8, 16, 32, 2, 8
    beta = 0.9

    key = jax.random.PRNGKey(0)
    ks = jax.random.split(key, 9)

    def linear_init(kw, kb, fan_in, fan_out):
        # Deterministic torch.nn.Linear-style uniform(-1/sqrt(fan_in), 1/sqrt(fan_in)).
        bound = 1.0 / float(fan_in) ** 0.5
        w = jax.random.uniform(kw, (fan_in, fan_out), jnp.float32, -bound, bound)
        b = jax.random.uniform(kb, (1, fan_out), jnp.float32, -bound, bound)
        return w, b

    w1, b1 = linear_init(ks[0], ks[1], D, H)    # fc1
    v1, vb1 = linear_init(ks[2], ks[3], H, H)   # rlif1.recurrent (all-to-all)
    w2, b2 = linear_init(ks[4], ks[5], H, O)    # fc2
    v2, vb2 = linear_init(ks[6], ks[7], O, O)   # rlif2.recurrent (all-to-all)
    x = jax.random.normal(ks[8], (B, D), jnp.float32)

    # Per-weight-set prep is done once and reused across forward calls.
    params = snn_prepare(w1, b1, v1, vb1, w2, b2, v2, vb2)

    # --- small-batch (gridless) path ---
    out = snn_apply(x, params, timesteps=T, beta=beta)
    out = jax.block_until_ready(out)
    assert out.shape == (T, B, O)
    assert out.dtype == jnp.float32
    ref = snn_reference(x, w1, b1, v1, vb1, w2, b2, v2, vb2, timesteps=T, beta=beta)
    assert bool(jnp.array_equal(out, jax.block_until_ready(ref))), \
        "kernel spike train mismatch vs pure-JAX reference (gridless path)"

    # --- larger-batch path exercising the ("parallel",) batch grid (v7x 2nd core) ---
    Bb = 128
    xb = jax.random.normal(jax.random.PRNGKey(1), (Bb, D), jnp.float32)
    outb = snn_apply(xb, params, timesteps=T, beta=beta, batch_block=64)
    outb = jax.block_until_ready(outb)
    assert outb.shape == (T, Bb, O)
    refb = snn_reference(xb, w1, b1, v1, vb1, w2, b2, v2, vb2, timesteps=T, beta=beta)
    assert bool(jnp.array_equal(outb, jax.block_until_ready(refb))), \
        "kernel spike train mismatch vs pure-JAX reference (batch-grid path)"

    print("KERNEL_OK")
</pallas_src>

<mosaic_0001>
module attributes {stable_mosaic.version = 11 : i64} {
  func.func @snn_kernel(%arg0: memref<8x32xf32, #tpu.memory_space<vmem>>, %arg1: memref<32x34xbf16, #tpu.memory_space<vmem>>, %arg2: memref<3x2xf32, #tpu.memory_space<vmem>>, %arg3: memref<8x128xf32, #tpu.memory_space<vmem>>) attributes {dimension_semantics = [], scalar_prefetch = 0 : i64, scratch_operands = 0 : i64, tpu.core_type = #tpu.core_type<tc>} {
    %c0 = arith.constant 0 : index
    %c0_0 = arith.constant 0 : index
    %0 = vector.load %arg0[%c0, %c0_0] : memref<8x32xf32, #tpu.memory_space<vmem>>, vector<8x32xf32>
    %c0_1 = arith.constant 0 : index
    %c0_2 = arith.constant 0 : index
    %1 = vector.load %arg1[%c0_1, %c0_2] : memref<32x34xbf16, #tpu.memory_space<vmem>>, vector<32x34xbf16>
    %c0_3 = arith.constant 0 : index
    %c0_4 = arith.constant 0 : index
    %2 = vector.load %arg2[%c0_3, %c0_4] : memref<3x2xf32, #tpu.memory_space<vmem>>, vector<3x2xf32>
    %3 = vector.extract_strided_slice %2 {offsets = [0, 0], sizes = [1, 2], strides = [1, 1]} : vector<3x2xf32> to vector<1x2xf32>
    %4 = vector.shape_cast %3 : vector<1x2xf32> to vector<1x2xf32>
    %5 = vector.broadcast %4 : vector<1x2xf32> to vector<8x2xf32>
    %6 = vector.extract_strided_slice %2 {offsets = [1, 0], sizes = [1, 2], strides = [1, 1]} : vector<3x2xf32> to vector<1x2xf32>
    %7 = vector.shape_cast %6 : vector<1x2xf32> to vector<1x2xf32>
    %8 = vector.broadcast %7 : vector<1x2xf32> to vector<8x2xf32>
    %9 = vector.extract_strided_slice %2 {offsets = [2, 0], sizes = [1, 2], strides = [1, 1]} : vector<3x2xf32> to vector<1x2xf32>
    %10 = vector.shape_cast %9 : vector<1x2xf32> to vector<1x2xf32>
    %11 = vector.broadcast %10 : vector<1x2xf32> to vector<8x2xf32>
    %cst = arith.constant 0.000000e+00 : f32
    %12 = vector.broadcast %cst : f32 to vector<8x32xf32>
    %cst_5 = arith.constant 0.000000e+00 : f32
    %13 = vector.broadcast %cst_5 : f32 to vector<8x32xf32>
    %cst_6 = arith.constant 0.000000e+00 : f32
    %14 = vector.broadcast %cst_6 : f32 to vector<8x2xf32>
    %cst_7 = arith.constant 0.000000e+00 : f32
    %15 = vector.broadcast %cst_7 : f32 to vector<8x2xf32>
    %cst_8 = arith.constant 0.000000e+00 : f32
    %16 = vector.broadcast %cst_8 : f32 to vector<8x32xf32>
    %cst_9 = arith.constant 0.899999976 : f32
    %17 = vector.broadcast %cst_9 : f32 to vector<8x32xf32>
    %18 = arith.mulf %17, %13 : vector<8x32xf32>
    %19 = arith.addf %18, %0 : vector<8x32xf32>
    %20 = arith.addf %19, %16 : vector<8x32xf32>
    %cst_10 = arith.constant 1.000000e+00 : f32
    %21 = vector.broadcast %cst_10 : f32 to vector<8x32xf32>
    %22 = arith.mulf %12, %21 : vector<8x32xf32>
    %23 = arith.subf %20, %22 : vector<8x32xf32>
    %cst_11 = arith.constant 1.000000e+00 : f32
    %24 = vector.broadcast %cst_11 : f32 to vector<8x32xf32>
    %25 = arith.cmpf ogt, %23, %24 : vector<8x32xf32>
    %26 = arith.extui %25 : vector<8x32xi1> to vector<8x32xi32>
    %27 = arith.sitofp %26 : vector<8x32xi32> to vector<8x32xf32>
    %28 = arith.truncf %27 : vector<8x32xf32> to vector<8x32xbf16>
    %cst_12 = arith.constant dense<0.000000e+00> : vector<8x34xf32>
    %29 = tpu.matmul %28, %1, %cst_12 {dimension_numbers = #tpu.dot_dimension_numbers<[1], [0], [0], [1], [0, 0, 1, 1], [], []>} : vector<8x32xbf16>, vector<32x34xbf16>, vector<8x34xf32> -> vector<8x34xf32>
    %30 = vector.extract_strided_slice %29 {offsets = [0, 0], sizes = [8, 32], strides = [1, 1]} : vector<8x34xf32> to vector<8x32xf32>
    %31 = vector.extract_strided_slice %29 {offsets = [0, 32], sizes = [8, 2], strides = [1, 1]} : vector<8x34xf32> to vector<8x2xf32>
    %32 = vector.extract_strided_slice %14 {offsets = [0, 0], sizes = [8, 1], strides = [1, 1]} : vector<8x2xf32> to vector<8x1xf32>
    %33 = vector.broadcast %32 : vector<8x1xf32> to vector<8x2xf32>
    %34 = arith.mulf %33, %5 : vector<8x2xf32>
    %35 = vector.extract_strided_slice %14 {offsets = [0, 1], sizes = [8, 1], strides = [1, 1]} : vector<8x2xf32> to vector<8x1xf32>
    %36 = vector.broadcast %35 : vector<8x1xf32> to vector<8x2xf32>
    %37 = arith.mulf %36, %8 : vector<8x2xf32>
    %38 = arith.addf %34, %37 : vector<8x2xf32>
    %cst_13 = arith.constant 0.899999976 : f32
    %39 = vector.broadcast %cst_13 : f32 to vector<8x2xf32>
    %40 = arith.mulf %39, %15 : vector<8x2xf32>
    %41 = arith.addf %40, %31 : vector<8x2xf32>
    %42 = arith.addf %41, %38 : vector<8x2xf32>
    %43 = arith.addf %42, %11 : vector<8x2xf32>
    %cst_14 = arith.constant 1.000000e+00 : f32
    %44 = vector.broadcast %cst_14 : f32 to vector<8x2xf32>
    %45 = arith.mulf %14, %44 : vector<8x2xf32>
    %46 = arith.subf %43, %45 : vector<8x2xf32>
    %cst_15 = arith.constant 1.000000e+00 : f32
    %47 = vector.broadcast %cst_15 : f32 to vector<8x2xf32>
    %48 = arith.cmpf ogt, %46, %47 : vector<8x2xf32>
    %49 = arith.extui %48 : vector<8x2xi1> to vector<8x2xi32>
    %50 = arith.sitofp %49 : vector<8x2xi32> to vector<8x2xf32>
    %cst_16 = arith.constant 0.899999976 : f32
    %51 = vector.broadcast %cst_16 : f32 to vector<8x32xf32>
    %52 = arith.mulf %51, %23 : vector<8x32xf32>
    %53 = arith.addf %52, %0 : vector<8x32xf32>
    %54 = arith.addf %53, %30 : vector<8x32xf32>
    %cst_17 = arith.constant 1.000000e+00 : f32
    %55 = vector.broadcast %cst_17 : f32 to vector<8x32xf32>
    %56 = arith.mulf %27, %55 : vector<8x32xf32>
    %57 = arith.subf %54, %56 : vector<8x32xf32>
    %cst_18 = arith.constant 1.000000e+00 : f32
    %58 = vector.broadcast %cst_18 : f32 to vector<8x32xf32>
    %59 = arith.cmpf ogt, %57, %58 : vector<8x32xf32>
    %60 = arith.extui %59 : vector<8x32xi1> to vector<8x32xi32>
    %61 = arith.sitofp %60 : vector<8x32xi32> to vector<8x32xf32>
    %62 = arith.truncf %61 : vector<8x32xf32> to vector<8x32xbf16>
    %cst_19 = arith.constant dense<0.000000e+00> : vector<8x34xf32>
    %63 = tpu.matmul %62, %1, %cst_19 {dimension_numbers = #tpu.dot_dimension_numbers<[1], [0], [0], [1], [0, 0, 1, 1], [], []>} : vector<8x32xbf16>, vector<32x34xbf16>, vector<8x34xf32> -> vector<8x34xf32>
    %64 = vector.extract_strided_slice %63 {offsets = [0, 0], sizes = [8, 32], strides = [1, 1]} : vector<8x34xf32> to vector<8x32xf32>
    %65 = vector.extract_strided_slice %63 {offsets = [0, 32], sizes = [8, 2], strides = [1, 1]} : vector<8x34xf32> to vector<8x2xf32>
    %66 = vector.extract_strided_slice %50 {offsets = [0, 0], sizes = [8, 1], strides = [1, 1]} : vector<8x2xf32> to vector<8x1xf32>
    %67 = vector.broadcast %66 : vector<8x1xf32> to vector<8x2xf32>
    %68 = arith.mulf %67, %5 : vector<8x2xf32>
    %69 = vector.extract_strided_slice %50 {offsets = [0, 1], sizes = [8, 1], strides = [1, 1]} : vector<8x2xf32> to vector<8x1xf32>
    %70 = vector.broadcast %69 : vector<8x1xf32> to vector<8x2xf32>
    %71 = arith.mulf %70, %8 : vector<8x2xf32>
    %72 = arith.addf %68, %71 : vector<8x2xf32>
    %cst_20 = arith.constant 0.899999976 : f32
    %73 = vector.broadcast %cst_20 : f32 to vector<8x2xf32>
    %74 = arith.mulf %73, %46 : vector<8x2xf32>
    %75 = arith.addf %74, %65 : vector<8x2xf32>
    %76 = arith.addf %75, %72 : vector<8x2xf32>
    %77 = arith.addf %76, %11 : vector<8x2xf32>
    %cst_21 = arith.constant 1.000000e+00 : f32
    %78 = vector.broadcast %cst_21 : f32 to vector<8x2xf32>
    %79 = arith.mulf %50, %78 : vector<8x2xf32>
    %80 = arith.subf %77, %79 : vector<8x2xf32>
    %cst_22 = arith.constant 1.000000e+00 : f32
    %81 = vector.broadcast %cst_22 : f32 to vector<8x2xf32>
    %82 = arith.cmpf ogt, %80, %81 : vector<8x2xf32>
    %83 = arith.extui %82 : vector<8x2xi1> to vector<8x2xi32>
    %84 = arith.sitofp %83 : vector<8x2xi32> to vector<8x2xf32>
    %cst_23 = arith.constant 0.899999976 : f32
    %85 = vector.broadcast %cst_23 : f32 to vector<8x32xf32>
    %86 = arith.mulf %85, %57 : vector<8x32xf32>
    %87 = arith.addf %86, %0 : vector<8x32xf32>
    %88 = arith.addf %87, %64 : vector<8x32xf32>
    %cst_24 = arith.constant 1.000000e+00 : f32
    %89 = vector.broadcast %cst_24 : f32 to vector<8x32xf32>
    %90 = arith.mulf %61, %89 : vector<8x32xf32>
    %91 = arith.subf %88, %90 : vector<8x32xf32>
    %cst_25 = arith.constant 1.000000e+00 : f32
    %92 = vector.broadcast %cst_25 : f32 to vector<8x32xf32>
    %93 = arith.cmpf ogt, %91, %92 : vector<8x32xf32>
    %94 = arith.extui %93 : vector<8x32xi1> to vector<8x32xi32>
    %95 = arith.sitofp %94 : vector<8x32xi32> to vector<8x32xf32>
    %96 = arith.truncf %95 : vector<8x32xf32> to vector<8x32xbf16>
    %cst_26 = arith.constant dense<0.000000e+00> : vector<8x34xf32>
    %97 = tpu.matmul %96, %1, %cst_26 {dimension_numbers = #tpu.dot_dimension_numbers<[1], [0], [0], [1], [0, 0, 1, 1], [], []>} : vector<8x32xbf16>, vector<32x34xbf16>, vector<8x34xf32> -> vector<8x34xf32>
    %98 = vector.extract_strided_slice %97 {offsets = [0, 0], sizes = [8, 32], strides = [1, 1]} : vector<8x34xf32> to vector<8x32xf32>
    %99 = vector.extract_strided_slice %97 {offsets = [0, 32], sizes = [8, 2], strides = [1, 1]} : vector<8x34xf32> to vector<8x2xf32>
    %100 = vector.extract_strided_slice %84 {offsets = [0, 0], sizes = [8, 1], strides = [1, 1]} : vector<8x2xf32> to vector<8x1xf32>
    %101 = vector.broadcast %100 : vector<8x1xf32> to vector<8x2xf32>
    %102 = arith.mulf %101, %5 : vector<8x2xf32>
    %103 = vector.extract_strided_slice %84 {offsets = [0, 1], sizes = [8, 1], strides = [1, 1]} : vector<8x2xf32> to vector<8x1xf32>
    %104 = vector.broadcast %103 : vector<8x1xf32> to vector<8x2xf32>
    %105 = arith.mulf %104, %8 : vector<8x2xf32>
    %106 = arith.addf %102, %105 : vector<8x2xf32>
    %cst_27 = arith.constant 0.899999976 : f32
    %107 = vector.broadcast %cst_27 : f32 to vector<8x2xf32>
    %108 = arith.mulf %107, %80 : vector<8x2xf32>
    %109 = arith.addf %108, %99 : vector<8x2xf32>
    %110 = arith.addf %109, %106 : vector<8x2xf32>
    %111 = arith.addf %110, %11 : vector<8x2xf32>
    %cst_28 = arith.constant 1.000000e+00 : f32
    %112 = vector.broadcast %cst_28 : f32 to vector<8x2xf32>
    %113 = arith.mulf %84, %112 : vector<8x2xf32>
    %114 = arith.subf %111, %113 : vector<8x2xf32>
    %cst_29 = arith.constant 1.000000e+00 : f32
    %115 = vector.broadcast %cst_29 : f32 to vector<8x2xf32>
    %116 = arith.cmpf ogt, %114, %115 : vector<8x2xf32>
    %117 = arith.extui %116 : vector<8x2xi1> to vector<8x2xi32>
    %118 = arith.sitofp %117 : vector<8x2xi32> to vector<8x2xf32>
    %cst_30 = arith.constant 0.899999976 : f32
    %119 = vector.broadcast %cst_30 : f32 to vector<8x32xf32>
    %120 = arith.mulf %119, %91 : vector<8x32xf32>
    %121 = arith.addf %120, %0 : vector<8x32xf32>
    %122 = arith.addf %121, %98 : vector<8x32xf32>
    %cst_31 = arith.constant 1.000000e+00 : f32
    %123 = vector.broadcast %cst_31 : f32 to vector<8x32xf32>
    %124 = arith.mulf %95, %123 : vector<8x32xf32>
    %125 = arith.subf %122, %124 : vector<8x32xf32>
    %cst_32 = arith.constant 1.000000e+00 : f32
    %126 = vector.broadcast %cst_32 : f32 to vector<8x32xf32>
    %127 = arith.cmpf ogt, %125, %126 : vector<8x32xf32>
    %128 = arith.extui %127 : vector<8x32xi1> to vector<8x32xi32>
    %129 = arith.sitofp %128 : vector<8x32xi32> to vector<8x32xf32>
    %130 = arith.truncf %129 : vector<8x32xf32> to vector<8x32xbf16>
    %cst_33 = arith.constant dense<0.000000e+00> : vector<8x34xf32>
    %131 = tpu.matmul %130, %1, %cst_33 {dimension_numbers = #tpu.dot_dimension_numbers<[1], [0], [0], [1], [0, 0, 1, 1], [], []>} : vector<8x32xbf16>, vector<32x34xbf16>, vector<8x34xf32> -> vector<8x34xf32>
    %132 = vector.extract_strided_slice %131 {offsets = [0, 0], sizes = [8, 32], strides = [1, 1]} : vector<8x34xf32> to vector<8x32xf32>
    %133 = vector.extract_strided_slice %131 {offsets = [0, 32], sizes = [8, 2], strides = [1, 1]} : vector<8x34xf32> to vector<8x2xf32>
    %134 = vector.extract_strided_slice %118 {offsets = [0, 0], sizes = [8, 1], strides = [1, 1]} : vector<8x2xf32> to vector<8x1xf32>
    %135 = vector.broadcast %134 : vector<8x1xf32> to vector<8x2xf32>
    %136 = arith.mulf %135, %5 : vector<8x2xf32>
    %137 = vector.extract_strided_slice %118 {offsets = [0, 1], sizes = [8, 1], strides = [1, 1]} : vector<8x2xf32> to vector<8x1xf32>
    %138 = vector.broadcast %137 : vector<8x1xf32> to vector<8x2xf32>
    %139 = arith.mulf %138, %8 : vector<8x2xf32>
    %140 = arith.addf %136, %139 : vector<8x2xf32>
    %cst_34 = arith.constant 0.899999976 : f32
    %141 = vector.broadcast %cst_34 : f32 to vector<8x2xf32>
    %142 = arith.mulf %141, %114 : vector<8x2xf32>
    %143 = arith.addf %142, %133 : vector<8x2xf32>
    %144 = arith.addf %143, %140 : vector<8x2xf32>
    %145 = arith.addf %144, %11 : vector<8x2xf32>
    %cst_35 = arith.constant 1.000000e+00 : f32
    %146 = vector.broadcast %cst_35 : f32 to vector<8x2xf32>
    %147 = arith.mulf %118, %146 : vector<8x2xf32>
    %148 = arith.subf %145, %147 : vector<8x2xf32>
    %cst_36 = arith.constant 1.000000e+00 : f32
    %149 = vector.broadcast %cst_36 : f32 to vector<8x2xf32>
    %150 = arith.cmpf ogt, %148, %149 : vector<8x2xf32>
    %151 = arith.extui %150 : vector<8x2xi1> to vector<8x2xi32>
    %152 = arith.sitofp %151 : vector<8x2xi32> to vector<8x2xf32>
    %cst_37 = arith.constant 0.899999976 : f32
    %153 = vector.broadcast %cst_37 : f32 to vector<8x32xf32>
    %154 = arith.mulf %153, %125 : vector<8x32xf32>
    %155 = arith.addf %154, %0 : vector<8x32xf32>
    %156 = arith.addf %155, %132 : vector<8x32xf32>
    %cst_38 = arith.constant 1.000000e+00 : f32
    %157 = vector.broadcast %cst_38 : f32 to vector<8x32xf32>
    %158 = arith.mulf %129, %157 : vector<8x32xf32>
    %159 = arith.subf %156, %158 : vector<8x32xf32>
    %cst_39 = arith.constant 1.000000e+00 : f32
    %160 = vector.broadcast %cst_39 : f32 to vector<8x32xf32>
    %161 = arith.cmpf ogt, %159, %160 : vector<8x32xf32>
    %162 = arith.extui %161 : vector<8x32xi1> to vector<8x32xi32>
    %163 = arith.sitofp %162 : vector<8x32xi32> to vector<8x32xf32>
    %164 = arith.truncf %163 : vector<8x32xf32> to vector<8x32xbf16>
    %cst_40 = arith.constant dense<0.000000e+00> : vector<8x34xf32>
    %165 = tpu.matmul %164, %1, %cst_40 {dimension_numbers = #tpu.dot_dimension_numbers<[1], [0], [0], [1], [0, 0, 1, 1], [], []>} : vector<8x32xbf16>, vector<32x34xbf16>, vector<8x34xf32> -> vector<8x34xf32>
    %166 = vector.extract_strided_slice %165 {offsets = [0, 0], sizes = [8, 32], strides = [1, 1]} : vector<8x34xf32> to vector<8x32xf32>
    %167 = vector.extract_strided_slice %165 {offsets = [0, 32], sizes = [8, 2], strides = [1, 1]} : vector<8x34xf32> to vector<8x2xf32>
    %168 = vector.extract_strided_slice %152 {offsets = [0, 0], sizes = [8, 1], strides = [1, 1]} : vector<8x2xf32> to vector<8x1xf32>
    %169 = vector.broadcast %168 : vector<8x1xf32> to vector<8x2xf32>
    %170 = arith.mulf %169, %5 : vector<8x2xf32>
    %171 = vector.extract_strided_slice %152 {offsets = [0, 1], sizes = [8, 1], strides = [1, 1]} : vector<8x2xf32> to vector<8x1xf32>
    %172 = vector.broadcast %171 : vector<8x1xf32> to vector<8x2xf32>
    %173 = arith.mulf %172, %8 : vector<8x2xf32>
    %174 = arith.addf %170, %173 : vector<8x2xf32>
    %cst_41 = arith.constant 0.899999976 : f32
    %175 = vector.broadcast %cst_41 : f32 to vector<8x2xf32>
    %176 = arith.mulf %175, %148 : vector<8x2xf32>
    %177 = arith.addf %176, %167 : vector<8x2xf32>
    %178 = arith.addf %177, %174 : vector<8x2xf32>
    %179 = arith.addf %178, %11 : vector<8x2xf32>
    %cst_42 = arith.constant 1.000000e+00 : f32
    %180 = vector.broadcast %cst_42 : f32 to vector<8x2xf32>
    %181 = arith.mulf %152, %180 : vector<8x2xf32>
    %182 = arith.subf %179, %181 : vector<8x2xf32>
    %cst_43 = arith.constant 1.000000e+00 : f32
    %183 = vector.broadcast %cst_43 : f32 to vector<8x2xf32>
    %184 = arith.cmpf ogt, %182, %183 : vector<8x2xf32>
    %185 = arith.extui %184 : vector<8x2xi1> to vector<8x2xi32>
    %186 = arith.sitofp %185 : vector<8x2xi32> to vector<8x2xf32>
    %cst_44 = arith.constant 0.899999976 : f32
    %187 = vector.broadcast %cst_44 : f32 to vector<8x32xf32>
    %188 = arith.mulf %187, %159 : vector<8x32xf32>
    %189 = arith.addf %188, %0 : vector<8x32xf32>
    %190 = arith.addf %189, %166 : vector<8x32xf32>
    %cst_45 = arith.constant 1.000000e+00 : f32
    %191 = vector.broadcast %cst_45 : f32 to vector<8x32xf32>
    %192 = arith.mulf %163, %191 : vector<8x32xf32>
    %193 = arith.subf %190, %192 : vector<8x32xf32>
    %cst_46 = arith.constant 1.000000e+00 : f32
    %194 = vector.broadcast %cst_46 : f32 to vector<8x32xf32>
    %195 = arith.cmpf ogt, %193, %194 : vector<8x32xf32>
    %196 = arith.extui %195 : vector<8x32xi1> to vector<8x32xi32>
    %197 = arith.sitofp %196 : vector<8x32xi32> to vector<8x32xf32>
    %198 = arith.truncf %197 : vector<8x32xf32> to vector<8x32xbf16>
    %cst_47 = arith.constant dense<0.000000e+00> : vector<8x34xf32>
    %199 = tpu.matmul %198, %1, %cst_47 {dimension_numbers = #tpu.dot_dimension_numbers<[1], [0], [0], [1], [0, 0, 1, 1], [], []>} : vector<8x32xbf16>, vector<32x34xbf16>, vector<8x34xf32> -> vector<8x34xf32>
    %200 = vector.extract_strided_slice %199 {offsets = [0, 0], sizes = [8, 32], strides = [1, 1]} : vector<8x34xf32> to vector<8x32xf32>
    %201 = vector.extract_strided_slice %199 {offsets = [0, 32], sizes = [8, 2], strides = [1, 1]} : vector<8x34xf32> to vector<8x2xf32>
    %202 = vector.extract_strided_slice %186 {offsets = [0, 0], sizes = [8, 1], strides = [1, 1]} : vector<8x2xf32> to vector<8x1xf32>
    %203 = vector.broadcast %202 : vector<8x1xf32> to vector<8x2xf32>
    %204 = arith.mulf %203, %5 : vector<8x2xf32>
    %205 = vector.extract_strided_slice %186 {offsets = [0, 1], sizes = [8, 1], strides = [1, 1]} : vector<8x2xf32> to vector<8x1xf32>
    %206 = vector.broadcast %205 : vector<8x1xf32> to vector<8x2xf32>
    %207 = arith.mulf %206, %8 : vector<8x2xf32>
    %208 = arith.addf %204, %207 : vector<8x2xf32>
    %cst_48 = arith.constant 0.899999976 : f32
    %209 = vector.broadcast %cst_48 : f32 to vector<8x2xf32>
    %210 = arith.mulf %209, %182 : vector<8x2xf32>
    %211 = arith.addf %210, %201 : vector<8x2xf32>
    %212 = arith.addf %211, %208 : vector<8x2xf32>
    %213 = arith.addf %212, %11 : vector<8x2xf32>
    %cst_49 = arith.constant 1.000000e+00 : f32
    %214 = vector.broadcast %cst_49 : f32 to vector<8x2xf32>
    %215 = arith.mulf %186, %214 : vector<8x2xf32>
    %216 = arith.subf %213, %215 : vector<8x2xf32>
    %cst_50 = arith.constant 1.000000e+00 : f32
    %217 = vector.broadcast %cst_50 : f32 to vector<8x2xf32>
    %218 = arith.cmpf ogt, %216, %217 : vector<8x2xf32>
    %219 = arith.extui %218 : vector<8x2xi1> to vector<8x2xi32>
    %220 = arith.sitofp %219 : vector<8x2xi32> to vector<8x2xf32>
    %cst_51 = arith.constant 0.899999976 : f32
    %221 = vector.broadcast %cst_51 : f32 to vector<8x32xf32>
    %222 = arith.mulf %221, %193 : vector<8x32xf32>
    %223 = arith.addf %222, %0 : vector<8x32xf32>
    %224 = arith.addf %223, %200 : vector<8x32xf32>
    %cst_52 = arith.constant 1.000000e+00 : f32
    %225 = vector.broadcast %cst_52 : f32 to vector<8x32xf32>
    %226 = arith.mulf %197, %225 : vector<8x32xf32>
    %227 = arith.subf %224, %226 : vector<8x32xf32>
    %cst_53 = arith.constant 1.000000e+00 : f32
    %228 = vector.broadcast %cst_53 : f32 to vector<8x32xf32>
    %229 = arith.cmpf ogt, %227, %228 : vector<8x32xf32>
    %230 = arith.extui %229 : vector<8x32xi1> to vector<8x32xi32>
    %231 = arith.sitofp %230 : vector<8x32xi32> to vector<8x32xf32>
    %232 = arith.truncf %231 : vector<8x32xf32> to vector<8x32xbf16>
    %cst_54 = arith.constant dense<0.000000e+00> : vector<8x34xf32>
    %233 = tpu.matmul %232, %1, %cst_54 {dimension_numbers = #tpu.dot_dimension_numbers<[1], [0], [0], [1], [0, 0, 1, 1], [], []>} : vector<8x32xbf16>, vector<32x34xbf16>, vector<8x34xf32> -> vector<8x34xf32>
    %234 = vector.extract_strided_slice %233 {offsets = [0, 0], sizes = [8, 32], strides = [1, 1]} : vector<8x34xf32> to vector<8x32xf32>
    %235 = vector.extract_strided_slice %233 {offsets = [0, 32], sizes = [8, 2], strides = [1, 1]} : vector<8x34xf32> to vector<8x2xf32>
    %236 = vector.extract_strided_slice %220 {offsets = [0, 0], sizes = [8, 1], strides = [1, 1]} : vector<8x2xf32> to vector<8x1xf32>
    %237 = vector.broadcast %236 : vector<8x1xf32> to vector<8x2xf32>
    %238 = arith.mulf %237, %5 : vector<8x2xf32>
    %239 = vector.extract_strided_slice %220 {offsets = [0, 1], sizes = [8, 1], strides = [1, 1]} : vector<8x2xf32> to vector<8x1xf32>
    %240 = vector.broadcast %239 : vector<8x1xf32> to vector<8x2xf32>
    %241 = arith.mulf %240, %8 : vector<8x2xf32>
    %242 = arith.addf %238, %241 : vector<8x2xf32>
    %cst_55 = arith.constant 0.899999976 : f32
    %243 = vector.broadcast %cst_55 : f32 to vector<8x2xf32>
    %244 = arith.mulf %243, %216 : vector<8x2xf32>
    %245 = arith.addf %244, %235 : vector<8x2xf32>
    %246 = arith.addf %245, %242 : vector<8x2xf32>
    %247 = arith.addf %246, %11 : vector<8x2xf32>
    %cst_56 = arith.constant 1.000000e+00 : f32
    %248 = vector.broadcast %cst_56 : f32 to vector<8x2xf32>
    %249 = arith.mulf %220, %248 : vector<8x2xf32>
    %250 = arith.subf %247, %249 : vector<8x2xf32>
    %cst_57 = arith.constant 1.000000e+00 : f32
    %251 = vector.broadcast %cst_57 : f32 to vector<8x2xf32>
    %252 = arith.cmpf ogt, %250, %251 : vector<8x2xf32>
    %253 = arith.extui %252 : vector<8x2xi1> to vector<8x2xi32>
    %254 = arith.sitofp %253 : vector<8x2xi32> to vector<8x2xf32>
    %cst_58 = arith.constant 0.899999976 : f32
    %255 = vector.broadcast %cst_58 : f32 to vector<8x32xf32>
    %256 = arith.mulf %255, %227 : vector<8x32xf32>
    %257 = arith.addf %256, %0 : vector<8x32xf32>
    %258 = arith.addf %257, %234 : vector<8x32xf32>
    %cst_59 = arith.constant 1.000000e+00 : f32
    %259 = vector.broadcast %cst_59 : f32 to vector<8x32xf32>
    %260 = arith.mulf %231, %259 : vector<8x32xf32>
    %261 = arith.subf %258, %260 : vector<8x32xf32>
    %cst_60 = arith.constant 1.000000e+00 : f32
    %262 = vector.broadcast %cst_60 : f32 to vector<8x32xf32>
    %263 = arith.cmpf ogt, %261, %262 : vector<8x32xf32>
    %264 = arith.extui %263 : vector<8x32xi1> to vector<8x32xi32>
    %265 = arith.sitofp %264 : vector<8x32xi32> to vector<8x32xf32>
    %266 = arith.truncf %265 : vector<8x32xf32> to vector<8x32xbf16>
    %cst_61 = arith.constant dense<0.000000e+00> : vector<8x34xf32>
    %267 = tpu.matmul %266, %1, %cst_61 {dimension_numbers = #tpu.dot_dimension_numbers<[1], [0], [0], [1], [0, 0, 1, 1], [], []>} : vector<8x32xbf16>, vector<32x34xbf16>, vector<8x34xf32> -> vector<8x34xf32>
    %268 = vector.extract_strided_slice %267 {offsets = [0, 32], sizes = [8, 2], strides = [1, 1]} : vector<8x34xf32> to vector<8x2xf32>
    %269 = vector.extract_strided_slice %254 {offsets = [0, 0], sizes = [8, 1], strides = [1, 1]} : vector<8x2xf32> to vector<8x1xf32>
    %270 = vector.broadcast %269 : vector<8x1xf32> to vector<8x2xf32>
    %271 = arith.mulf %270, %5 : vector<8x2xf32>
    %272 = vector.extract_strided_slice %254 {offsets = [0, 1], sizes = [8, 1], strides = [1, 1]} : vector<8x2xf32> to vector<8x1xf32>
    %273 = vector.broadcast %272 : vector<8x1xf32> to vector<8x2xf32>
    %274 = arith.mulf %273, %8 : vector<8x2xf32>
    %275 = arith.addf %271, %274 : vector<8x2xf32>
    %cst_62 = arith.constant 0.899999976 : f32
    %276 = vector.broadcast %cst_62 : f32 to vector<8x2xf32>
    %277 = arith.mulf %276, %250 : vector<8x2xf32>
    %278 = arith.addf %277, %268 : vector<8x2xf32>
    %279 = arith.addf %278, %275 : vector<8x2xf32>
    %280 = arith.addf %279, %11 : vector<8x2xf32>
    %cst_63 = arith.constant 1.000000e+00 : f32
    %281 = vector.broadcast %cst_63 : f32 to vector<8x2xf32>
    %282 = arith.mulf %254, %281 : vector<8x2xf32>
    %283 = arith.subf %280, %282 : vector<8x2xf32>
    %cst_64 = arith.constant 1.000000e+00 : f32
    %284 = vector.broadcast %cst_64 : f32 to vector<8x2xf32>
    %285 = arith.cmpf ogt, %283, %284 : vector<8x2xf32>
    %286 = arith.extui %285 : vector<8x2xi1> to vector<8x2xi32>
    %287 = arith.sitofp %286 : vector<8x2xi32> to vector<8x2xf32>
    %cst_65 = arith.constant 0.000000e+00 : f32
    %288 = vector.broadcast %cst_65 : f32 to vector<8x112xf32>
    %289 = tpu.concatenate %50, %84, %118, %152, %186, %220, %254, %287, %288 in 1 : vector<8x2xf32>, vector<8x2xf32>, vector<8x2xf32>, vector<8x2xf32>, vector<8x2xf32>, vector<8x2xf32>, vector<8x2xf32>, vector<8x2xf32>, vector<8x112xf32> -> vector<8x128xf32>
    %c0_66 = arith.constant 0 : index
    %c0_67 = arith.constant 0 : index
    %290 = vector.load %arg3[%c0_66, %c0_67] : memref<8x128xf32, #tpu.memory_space<vmem>>, vector<8x128xf32>
    tpu.vector_store %arg3[%c0_66, %c0_67], %289 {strides = array<i32>} : memref<8x128xf32, #tpu.memory_space<vmem>>, vector<8x128xf32>,
    return
  }
}

</mosaic_0001>

<bundles_post_ra>
// kernel: snn_apply.1
= control target key start
LH: loop header
LB: loop body
LE: loop exit
PB: predicated region body
PF: predicated region fallthrough
CT: control target
= control target key end

     0   :  { %v21_v0 = vlaneseq  ;;  %v820_v1 = vmov 0.0   ;;  %vm821_vm0 = vmmov 0   ;;  %vm51_vm2 = vcmask 261120   ;;  %s827_s20 = smov 104   ;;  %s828_s21 = smov 108   ;;  %s1032_s1 = inlined_call_operand.vmem [shape: bf16[32,34], index: 1, kind: input, shape index: {}]   ;;  %s1033_s0 = inlined_call_operand.vmem [shape: f32[8,32], index: 0, kind: input, shape index: {}]   ;;  %s1034_s2 = inlined_call_operand.vmem [shape: f32[3,2], index: 2, kind: input, shape index: {}]   ;;  %s1035_s3 = inlined_call_operand.vmem [shape: f32[8,128], index: 3, kind: output, shape index: {}]  }
   0x1   :  { %733 = vmatprep.subr.bf16.mxu0 %v820_v1  ;;  %v857_v2 = vld [vmem:[%s1032_s1] sm:$0xff]   ;;  %737 = vmatprep.mubr.msk.bf16.mxu0 %vm821_vm0, %v820_v1  ;;  %v868_v4 = vld [vmem:[%s1032_s1 + $0x8] sm:$0xff]   ;;  %v823_v18 = vmov 32   ;;  %v824_v19 = vmov 33   ;;  %s825_s1 = smov 96   ;;  %s829_s22 = smov 98  }
   0x2   :  { %v22_v3 = vshrl.u32 %v21_v0, 7  ;;  %741 = vmatprep.subr.bf16.mxu1 %v820_v1  ;;  %745 = vmatprep.mubr.msk.bf16.mxu1 %vm821_vm0, %v820_v1  ;;  %v873_v5 = vld [vmem:[%s1033_s0] sm:$0xff]  ;;  %s822_s0 = smov 32   ;;  %s830_s23 = smov 102  }
   0x3   :  { %734 = vmatpush3.bf16.msra.mxu0 %v857_v2  ;;  %v20_v6 = vld [vmem:[%s1034_s2] sm:$0x7]  ;;  %742 = vmatpush3.bf16.msra.mxu1 %v857_v2  ;;  %vm35_vm1 = vcmp.gt.f32.partialorder %v873_v5, 1.0  ;;  %v112_v20 = vmul.f32 0.9, %v873_v5  ;;  %s826_s2 = smov 100  }
   0x4   :  { %735 = vmatprep.subr.bf16.mxu0 %v820_v1  ;;  %v23_v7 = vsub.s32 0, %v22_v3  ;;  %v27_v8 = vsub.s32 1, %v22_v3  ;;  %743 = vmatprep.subr.bf16.mxu1 %v820_v1  ;;  %v683_v9 = vsel %vm35_vm1, 1.0, %v820_v1  ;;  %v31_v15 = vsub.s32 2, %v22_v3  ;;  %s831_s24 = smov 106   ;;  %s832_s25 = smov 110  }
   0x5   :  { %v38_v10 = vpack.c.bf16 %v683_v9, %v683_v9  ;;  %810 = vset.pattern.permute.xlu1 %v823_v18  ;;  %813 = vset.pattern.permute.xlu0 %v824_v19  ;;  %v113_v22 = vadd.f32 %v112_v20, %v873_v5 }
   0x6   :  { %v883_v11 = vrot.slane %v20_v6, %v23_v7  ;;  %v885_v12 = vrot.slane %v20_v6, %v27_v8  ;;  %v32_v17 = vrot.slane %v20_v6, %v31_v15 }
   0x7   :  { %736 = vmatpush3.bf16.msra.mxu0 %v868_v4  ;;  %744 = vmatpush3.bf16.msra.mxu1 %v868_v4 }
   0x8   :  { %v95_v13 = vmul.f32 0.0, %v883_v11  ;;  %v96_v14 = vmul.f32 0.0, %v885_v12  ;;  %749 = vmatprep.subr.bf16.mxu0 %v820_v1  ;;  %757 = vmatprep.subr.bf16.mxu1 %v820_v1 }
   0xa   :  { %738 = vmatmul.mubr.msk.bf16.vlgmr.msra.gmra.mrb[0].mxu0 %vm51_vm2, %v38_v10  ;;  %v97_v16 = vadd.f32 %v96_v14, %v95_v13 }
   0xb   :  { %750 = vmatpush3.bf16.msra.mxu0 %v857_v2  ;;  %753 = vmatprep.mubr.msk.bf16.mxu0 %vm821_vm0, %v820_v1 }
   0xc   :  { %100 = vrot.lane.b32.xlu0 %v97_v16, %s822_s0  ;;  %751 = vmatprep.subr.bf16.mxu0 %v820_v1 }
   0xf   :  { %752 = vmatpush3.bf16.msra.mxu0 %v868_v4 }
  0x10   :  { %105 = vrot.lane.b32.xlu0 %v32_v17, %s822_s0  ;;  %765 = vmatprep.subr.bf16.mxu0 %v820_v1 }
  0x7e   :  { %v101_v21 = vpop.permute.xlu0 %100 }
  0x82   :  { %v906_v24 = vpop.permute.xlu0 %105 }
  0xdd   :  { %v89_v23 = vpop.f32.mrb[0].mxu0 }
  0xde   :  { %v103_v25 = vadd.f32 %v101_v21, %v89_v23  ;;  %v114_v26 = vadd.f32 %v113_v22, %v89_v23  ;;  %v739_v27 = vpop.f32.mrb[1].mxu0 }
  0xdf   :  { %v92_v28 = vpop.f32.mrb[2].mxu0 }
  0xe0   :  { %v115_v29 = vsub.f32 %v114_v26, %v683_v9  ;;  %v740_v30 = vpop.f32.mrb[3].mxu0  ;;  %v108_v31 = vadd.f32 %v906_v24, %v103_v25 }
  0xe2   :  { %vm116_vm3 = vcmp.gt.f32.partialorder %v115_v29, 1.0  ;;  %vm109_vm4 = vcmp.gt.f32.partialorder %v108_v31, 1.0  ;;  %v187_v40 = vmul.f32 0.9, %v115_v29  ;;  %v175_v41 = vmul.f32 0.9, %v108_v31 }
  0xe3   :  { %v688_v32 = vsel %vm116_vm3, 1.0, %v820_v1  ;;  %v911_v33 = vsel %vm109_vm4, 1.0, %v820_v1  ;;  %vm664_vm3 = vcmask 31744   ;;  %vm666_vm4 = vcmask 48128  }
  0xe4   :  { %165 = vperm.xlu1 %810, %v911_v33   ;;  %v119_v34 = vpack.c.bf16 %v688_v32, %v688_v32  ;;  %v188_v42 = vadd.f32 %v187_v40, %v873_v5 }
  0xe6   :  { %746 = vmatmul.mubr.msk.bf16.vlgmr.msra.gmra.mrb[0].mxu1 %vm51_vm2, %v119_v34 }
  0xe7   :  { %758 = vmatpush3.bf16.msra.mxu1 %v857_v2  ;;  %761 = vmatprep.mubr.msk.bf16.mxu1 %vm821_vm0, %v820_v1 }
  0xe8   :  { %811 = vset.pattern.permute.xlu1 %v824_v19  ;;  %759 = vmatprep.subr.bf16.mxu1 %v820_v1 }
  0xe9   :  { %170 = vperm.xlu1 %811, %v911_v33  }
  0xeb   :  { %760 = vmatpush3.bf16.msra.mxu1 %v868_v4 }
  0xec   :  { %773 = vmatprep.subr.bf16.mxu1 %v820_v1 }
  0xed   :  { %812 = vset.pattern.permute.xlu1 %v823_v18 }
 0x163   :  { %v166_v35 = vpop.permute.xlu1 %165 }
 0x164   :  { %v168_v37 = vmul.f32 %v166_v35, %v883_v11 }
 0x168   :  { %v171_v36 = vpop.permute.xlu1 %170 }
 0x169   :  { %v173_v38 = vmul.f32 %v171_v36, %v885_v12 }
 0x16b   :  { %v174_v39 = vadd.f32 %v173_v38, %v168_v37 }
 0x16d   :  { %178 = vrot.lane.b32.xlu0 %v174_v39, %s822_s0 }
 0x1b9   :  { %v157_v43 = vpop.f32.mrb[0].mxu1 }
 0x1ba   :  { %v176_v44 = vadd.f32 %v175_v41, %v157_v43  ;;  %v189_v45 = vadd.f32 %v188_v42, %v157_v43  ;;  %v747_v46 = vpop.f32.mrb[1].mxu1 }
 0x1bb   :  { %v160_v47 = vpop.f32.mrb[2].mxu1 }
 0x1bc   :  { %v190_v48 = vsub.f32 %v189_v45, %v688_v32  ;;  %v748_v49 = vpop.f32.mrb[3].mxu1 }
 0x1be   :  { %vm191_vm5 = vcmp.gt.f32.partialorder %v190_v48, 1.0  ;;  %v262_v62 = vmul.f32 0.9, %v190_v48 }
 0x1bf   :  { %v691_v50 = vsel %vm191_vm5, 1.0, %v820_v1  ;;  %vm668_vm5 = vcmask 64512  }
 0x1c0   :  { %v194_v51 = vpack.c.bf16 %v691_v50, %v691_v50  ;;  %v263_v0 = vadd.f32 %v262_v62, %v873_v5 }
 0x1c2   :  { %754 = vmatmul.mubr.msk.bf16.vlgmr.msra.gmra.mrb[4].mxu0 %vm51_vm2, %v194_v51 }
 0x1c3   :  { %766 = vmatpush3.bf16.msra.mxu0 %v857_v2  ;;  %769 = vmatprep.mubr.msk.bf16.mxu0 %vm821_vm0, %v820_v1 }
 0x1c4   :  { %767 = vmatprep.subr.bf16.mxu0 %v820_v1 }
 0x1c7   :  { %768 = vmatpush3.bf16.msra.mxu0 %v868_v4 }
 0x1c8   :  { %781 = vmatprep.subr.bf16.mxu0 %v820_v1 }
 0x1df   :  { %v179_v52 = vpop.permute.xlu0 %178 }
 0x1e0   :  { %v181_v53 = vadd.f32 %v179_v52, %v176_v44 }
 0x1e2   :  { %v182_v54 = vadd.f32 %v181_v53, %v906_v24 }
 0x1e4   :  { %v183_v55 = vsub.f32 %v182_v54, %v911_v33 }
 0x1e6   :  { %vm184_vm6 = vcmp.gt.f32.partialorder %v183_v55, 1.0  ;;  %v250_v63 = vmul.f32 0.9, %v183_v55 }
 0x1e7   :  { %v939_v56 = vsel %vm184_vm6, 1.0, %v820_v1  ;;  %vm670_vm6 = vcmask 80896  }
 0x1e8   :  { %245 = vperm.xlu0 %813, %v939_v56   ;;  %240 = vperm.xlu1 %812, %v939_v56  }
 0x267   :  { %v246_v57 = vpop.permute.xlu0 %245  ;;  %v241_v58 = vpop.permute.xlu1 %240 }
 0x268   :  { %v248_v59 = vmul.f32 %v246_v57, %v885_v12  ;;  %v243_v60 = vmul.f32 %v241_v58, %v883_v11 }
 0x26a   :  { %v249_v61 = vadd.f32 %v248_v59, %v243_v60 }
 0x26c   :  { %253 = vrot.lane.b32.xlu1 %v249_v61, %s822_s0 }
 0x295   :  { %v232_v3 = vpop.f32.mrb[4].mxu0 }
 0x296   :  { %v251_v6 = vadd.f32 %v250_v63, %v232_v3  ;;  %v264_v7 = vadd.f32 %v263_v0, %v232_v3  ;;  %v755_v8 = vpop.f32.mrb[5].mxu0 }
 0x297   :  { %v235_v9 = vpop.f32.mrb[6].mxu0 }
 0x298   :  { %v265_v10 = vsub.f32 %v264_v7, %v691_v50  ;;  %v756_v13 = vpop.f32.mrb[7].mxu0 }
 0x29a   :  { %vm266_vm7 = vcmp.gt.f32.partialorder %v265_v10, 1.0  ;;  %v337_v29 = vmul.f32 0.9, %v265_v10 }
 0x29b   :  { %v694_v14 = vsel %vm266_vm7, 1.0, %v820_v1  ;;  %vm672_vm7 = vcmask 97280  }
 0x29c   :  { %v269_v15 = vpack.c.bf16 %v694_v14, %v694_v14  ;;  %v338_v31 = vadd.f32 %v337_v29, %v873_v5 }
 0x29e   :  { %762 = vmatmul.mubr.msk.bf16.vlgmr.msra.gmra.mrb[4].mxu1 %vm51_vm2, %v269_v15 }
 0x29f   :  { %774 = vmatpush3.bf16.msra.mxu1 %v857_v2  ;;  %777 = vmatprep.mubr.msk.bf16.mxu1 %vm821_vm0, %v820_v1 }
 0x2a0   :  { %775 = vmatprep.subr.bf16.mxu1 %v820_v1 }
 0x2a3   :  { %776 = vmatpush3.bf16.msra.mxu1 %v868_v4 }
 0x2a4   :  { %789 = vmatprep.subr.bf16.mxu1 %v820_v1 }
 0x2de   :  { %v254_v16 = vpop.permute.xlu1 %253 }
 0x2df   :  { %v256_v17 = vadd.f32 %v254_v16, %v251_v6 }
 0x2e1   :  { %v257_v20 = vadd.f32 %v256_v17, %v906_v24 }
 0x2e3   :  { %v258_v21 = vsub.f32 %v257_v20, %v939_v56 }
 0x2e5   :  { %vm259_vm8 = vcmp.gt.f32.partialorder %v258_v21, 1.0  ;;  %v325_v30 = vmul.f32 0.9, %v258_v21 }
 0x2e6   :  { %v958_v22 = vsel %vm259_vm8, 1.0, %v820_v1  ;;  %vm674_vm8 = vcmask 113664  }
 0x2e7   :  { %320 = vperm.xlu0 %813, %v958_v22   ;;  %315 = vperm.xlu1 %812, %v958_v22  }
 0x2eb   :  { %814 = vset.pattern.permute.xlu0 %v823_v18  ;;  %815 = vset.pattern.permute.xlu1 %v824_v19 }
 0x366   :  { %v321_v23 = vpop.permute.xlu0 %320  ;;  %v316_v25 = vpop.permute.xlu1 %315 }
 0x367   :  { %v323_v26 = vmul.f32 %v321_v23, %v885_v12  ;;  %v318_v27 = vmul.f32 %v316_v25, %v883_v11 }
 0x369   :  { %v324_v28 = vadd.f32 %v323_v26, %v318_v27 }
 0x36b   :  { %328 = vrot.lane.b32.xlu1 %v324_v28, %s822_s0 }
 0x371   :  { %v307_v32 = vpop.f32.mrb[4].mxu1 }
 0x372   :  { %v326_v34 = vadd.f32 %v325_v30, %v307_v32  ;;  %v339_v35 = vadd.f32 %v338_v31, %v307_v32  ;;  %v763_v36 = vpop.f32.mrb[5].mxu1 }
 0x373   :  { %v310_v37 = vpop.f32.mrb[6].mxu1 }
 0x374   :  { %v340_v38 = vsub.f32 %v339_v35, %v694_v14  ;;  %v764_v39 = vpop.f32.mrb[7].mxu1 }
 0x376   :  { %vm341_vm9 = vcmp.gt.f32.partialorder %v340_v38, 1.0  ;;  %v412_v47 = vmul.f32 0.9, %v340_v38 }
 0x377   :  { %v697_v40 = vsel %vm341_vm9, 1.0, %v820_v1  ;;  %vm676_vm9 = vcmask 130048  }
 0x378   :  { %v344_v41 = vpack.c.bf16 %v697_v40, %v697_v40  ;;  %v413_v49 = vadd.f32 %v412_v47, %v873_v5 }
 0x37a   :  { %770 = vmatmul.mubr.msk.bf16.vlgmr.msra.gmra.mrb[8].mxu0 %vm51_vm2, %v344_v41 }
 0x37b   :  { %782 = vmatpush3.bf16.msra.mxu0 %v857_v2  ;;  %785 = vmatprep.mubr.msk.bf16.mxu0 %vm821_vm0, %v820_v1 }
 0x37c   :  { %783 = vmatprep.subr.bf16.mxu0 %v820_v1 }
 0x37f   :  { %784 = vmatpush3.bf16.msra.mxu0 %v868_v4 }
 0x3dd   :  { %v329_v42 = vpop.permute.xlu1 %328 }
 0x3de   :  { %v331_v43 = vadd.f32 %v329_v42, %v326_v34 }
 0x3e0   :  { %v332_v44 = vadd.f32 %v331_v43, %v906_v24 }
 0x3e2   :  { %v333_v45 = vsub.f32 %v332_v44, %v958_v22 }
 0x3e4   :  { %vm334_vm10 = vcmp.gt.f32.partialorder %v333_v45, 1.0  ;;  %v400_v48 = vmul.f32 0.9, %v333_v45 }
 0x3e5   :  { %v978_v46 = vsel %vm334_vm10, 1.0, %v820_v1 }
 0x3e6   :  { %395 = vperm.xlu1 %815, %v978_v46   ;;  %390 = vperm.xlu0 %814, %v978_v46  }
 0x44d   :  { %v382_v50 = vpop.f32.mrb[8].mxu0 }
 0x44e   :  { %v401_v51 = vadd.f32 %v400_v48, %v382_v50  ;;  %v414_v52 = vadd.f32 %v413_v49, %v382_v50  ;;  %v771_v53 = vpop.f32.mrb[9].mxu0 }
 0x44f   :  { %v385_v54 = vpop.f32.mrb[10].mxu0 }
 0x450   :  { %v415_v55 = vsub.f32 %v414_v52, %v697_v40  ;;  %v772_v57 = vpop.f32.mrb[11].mxu0 }
 0x452   :  { %vm416_vm11 = vcmp.gt.f32.partialorder %v415_v55, 1.0 }
 0x453   :  { %v700_v58 = vsel %vm416_vm11, 1.0, %v820_v1 }
 0x454   :  { %v419_v59 = vpack.c.bf16 %v700_v58, %v700_v58 }
 0x456   :  { %778 = vmatmul.mubr.msk.bf16.vlgmr.msra.gmra.mrb[8].mxu1 %vm51_vm2, %v419_v59 }
 0x457   :  { %790 = vmatpush3.bf16.msra.mxu1 %v857_v2  ;;  %793 = vmatprep.mubr.msk.bf16.mxu1 %vm821_vm0, %v820_v1 }
 0x458   :  { %791 = vmatprep.subr.bf16.mxu1 %v820_v1 }
 0x45b   :  { %792 = vmatpush3.bf16.msra.mxu1 %v868_v4  ;;  %v487_v4 = vmul.f32 0.9, %v415_v55 }
 0x45d   :  { %v488_v10 = vadd.f32 %v487_v4, %v873_v5 }
 0x465   :  { %v396_v60 = vpop.permute.xlu1 %395  ;;  %v391_v61 = vpop.permute.xlu0 %390 }
 0x466   :  { %v398_v62 = vmul.f32 %v396_v60, %v885_v12  ;;  %v393_v63 = vmul.f32 %v391_v61, %v883_v11 }
 0x468   :  { %v399_v0 = vadd.f32 %v398_v62, %v393_v63 }
 0x46a   :  { %403 = vrot.lane.b32.xlu1 %v399_v0, %s822_s0 }
 0x4dc   :  { %v404_v3 = vpop.permute.xlu1 %403 }
 0x4dd   :  { %v406_v6 = vadd.f32 %v404_v3, %v401_v51 }
 0x4df   :  { %v407_v2 = vadd.f32 %v406_v6, %v906_v24 }
 0x4e1   :  { %v408_v7 = vsub.f32 %v407_v2, %v978_v46 }
 0x4e3   :  { %vm409_vm12 = vcmp.gt.f32.partialorder %v408_v7, 1.0  ;;  %v475_v9 = vmul.f32 0.9, %v408_v7 }
 0x4e4   :  { %v996_v8 = vsel %vm409_vm12, 1.0, %v820_v1 }
 0x4e5   :  { %470 = vperm.xlu1 %815, %v996_v8   ;;  %465 = vperm.xlu0 %814, %v996_v8  }
 0x4e9   :  { %816 = vset.pattern.permute.xlu1 %v823_v18  ;;  %817 = vset.pattern.permute.xlu0 %v824_v19 }
 0x529   :  { %v457_v13 = vpop.f32.mrb[8].mxu1 }
 0x52a   :  { %v476_v14 = vadd.f32 %v475_v9, %v457_v13  ;;  %v489_v15 = vadd.f32 %v488_v10, %v457_v13  ;;  %v779_v16 = vpop.f32.mrb[9].mxu1 }
 0x52b   :  { %v460_v17 = vpop.f32.mrb[10].mxu1 }
 0x52c   :  { %v490_v20 = vsub.f32 %v489_v15, %v700_v58  ;;  %v780_v21 = vpop.f32.mrb[11].mxu1 }
 0x52e   :  { %vm491_vm13 = vcmp.gt.f32.partialorder %v490_v20, 1.0  ;;  %v562_v35 = vmul.f32 0.9, %v490_v20 }
 0x52f   :  { %v703_v23 = vsel %vm491_vm13, 1.0, %v820_v1 }
 0x530   :  { %v494_v25 = vpack.c.bf16 %v703_v23, %v703_v23  ;;  %v563_v37 = vadd.f32 %v562_v35, %v873_v5 }
 0x532   :  { %786 = vmatmul.mubr.msk.bf16.vlgmr.msra.gmra.mrb[12].mxu0 %vm51_vm2, %v494_v25 }
 0x564   :  { %v471_v18 = vpop.permute.xlu1 %470  ;;  %v466_v26 = vpop.permute.xlu0 %465 }
 0x565   :  { %v473_v19 = vmul.f32 %v471_v18, %v885_v12  ;;  %v468_v27 = vmul.f32 %v466_v26, %v883_v11 }
 0x567   :  { %v474_v28 = vadd.f32 %v473_v19, %v468_v27 }
 0x569   :  { %478 = vrot.lane.b32.xlu0 %v474_v28, %s822_s0 }
 0x5db   :  { %v479_v29 = vpop.permute.xlu0 %478 }
 0x5dc   :  { %v481_v30 = vadd.f32 %v479_v29, %v476_v14 }
 0x5de   :  { %v482_v31 = vadd.f32 %v481_v30, %v906_v24 }
 0x5e0   :  { %v483_v32 = vsub.f32 %v482_v31, %v996_v8 }
 0x5e2   :  { %vm484_vm14 = vcmp.gt.f32.partialorder %v483_v32, 1.0  ;;  %v550_v36 = vmul.f32 0.9, %v483_v32 }
 0x5e3   :  { %v702_v34 = vsel %vm484_vm14, 1.0, %v820_v1 }
 0x5e4   :  { %545 = vperm.xlu0 %817, %v702_v34   ;;  %540 = vperm.xlu1 %816, %v702_v34  }
 0x605   :  { %v532_v38 = vpop.f32.mrb[12].mxu0 }
 0x606   :  { %v551_v39 = vadd.f32 %v550_v36, %v532_v38  ;;  %v564_v40 = vadd.f32 %v563_v37, %v532_v38  ;;  %v787_v41 = vpop.f32.mrb[13].mxu0 }
 0x607   :  { %v535_v42 = vpop.f32.mrb[14].mxu0 }
 0x608   :  { %v565_v43 = vsub.f32 %v564_v40, %v703_v23  ;;  %v788_v44 = vpop.f32.mrb[15].mxu0 }
 0x60a   :  { %vm566_vm15 = vcmp.gt.f32.partialorder %v565_v43, 1.0 }
 0x60b   :  { %v706_v45 = vsel %vm566_vm15, 1.0, %v820_v1 }
 0x60c   :  { %v569_v47 = vpack.c.bf16 %v706_v45, %v706_v45 }
 0x60e   :  { %794 = vmatmul.mubr.msk.bf16.vlgmr.msra.gmra.mrb[12].mxu1 %vm51_vm2, %v569_v47  ;;  %vm662_vm2 = vcmask 15360  }
 0x663   :  { %v546_v48 = vpop.permute.xlu0 %545  ;;  %v541_v49 = vpop.permute.xlu1 %540 }
 0x664   :  { %v548_v50 = vmul.f32 %v546_v48, %v885_v12  ;;  %v543_v51 = vmul.f32 %v541_v49, %v883_v11 }
 0x666   :  { %v549_v5 = vadd.f32 %v548_v50, %v543_v51 }
 0x668   :  { %553 = vrot.lane.b32.xlu1 %v549_v5, %s822_s0 }
 0x6da   :  { %v554_v52 = vpop.permute.xlu1 %553 }
 0x6db   :  { %v556_v53 = vadd.f32 %v554_v52, %v551_v39 }
 0x6dd   :  { %v557_v54 = vadd.f32 %v556_v53, %v906_v24 }
 0x6df   :  { %v558_v55 = vsub.f32 %v557_v54, %v702_v34 }
 0x6e1   :  { %v607_v57 = vpop.f32.mrb[12].mxu1  ;;  %v625_v58 = vmul.f32 0.9, %v558_v55  ;;  %vm559_vm0 = vcmp.gt.f32.partialorder %v558_v55, 1.0 }
 0x6e2   :  { %v795_v59 = vpop.f32.mrb[13].mxu1  ;;  %v705_v60 = vsel %vm559_vm0, 1.0, %v820_v1 }
 0x6e3   :  { %v626_v61 = vadd.f32 %v625_v58, %v607_v57  ;;  %v610_v62 = vpop.f32.mrb[14].mxu1  ;;  %620 = vperm.xlu0 %817, %v705_v60   ;;  %615 = vperm.xlu1 %816, %v705_v60  }
 0x6e4   :  { %v796_v63 = vpop.f32.mrb[15].mxu1 }
 0x6e7   :  { %637 = vrot.lane.b32.xlu0 %v911_v33, %s825_s1 }
 0x6eb   :  { %643 = vrot.lane.b32.xlu0 %v958_v22, %s826_s2 }
 0x6ef   :  { %649 = vrot.lane.b32.xlu0 %v996_v8, %s827_s20 }
 0x6f3   :  { %655 = vrot.lane.b32.xlu0 %v705_v60, %s828_s21 }
 0x762   :  { %v621_v0 = vpop.permute.xlu0 %620  ;;  %v616_v3 = vpop.permute.xlu1 %615 }
 0x763   :  { %v623_v6 = vmul.f32 %v621_v0, %v885_v12  ;;  %v618_v2 = vmul.f32 %v616_v3, %v883_v11 }
 0x765   :  { %v624_v7 = vadd.f32 %v623_v6, %v618_v2 }
 0x766   :  { %v638_v11 = vpop.permute.xlu0 %637 }
 0x767   :  { %628 = vrot.lane.b32.xlu1 %v624_v7, %s822_s0 }
 0x76a   :  { %v644_v10 = vpop.permute.xlu0 %643 }
 0x76b   :  { %640 = vrot.lane.b32.xlu1 %v939_v56, %s829_s22 }
 0x76e   :  { %v650_v14 = vpop.permute.xlu0 %649 }
 0x76f   :  { %646 = vrot.lane.b32.xlu1 %v978_v46, %s830_s23 }
 0x773   :  { %652 = vrot.lane.b32.xlu1 %v702_v34, %s831_s24 }
 0x7d9   :  { %v629_v33 = vpop.permute.xlu1 %628 }
 0x7da   :  { %v631_v22 = vadd.f32 %v629_v33, %v626_v61 }
 0x7dc   :  { %v632_v8 = vadd.f32 %v631_v22, %v906_v24 }
 0x7dd   :  { %v641_v9 = vpop.permute.xlu1 %640 }
 0x7de   :  { %v633_v4 = vsub.f32 %v632_v8, %v705_v60  ;;  %v663_v13 = vsel %vm662_vm2, %v638_v11, %v641_v9 }
 0x7df   :  { %v665_v46 = vsel %vm664_vm3, %v663_v13, %v644_v10 }
 0x7e0   :  { %vm634_vm1 = vcmp.gt.f32.partialorder %v633_v4, 1.0 }
 0x7e1   :  { %v708_v12 = vsel %vm634_vm1, 1.0, %v820_v1  ;;  %v647_v56 = vpop.permute.xlu1 %646  ;;  %v656_v1 = vpop.permute.xlu0 %655 }
 0x7e2   :  { %659 = vrot.lane.b32.xlu1 %v708_v12, %s832_s25  ;;  %v667_v15 = vsel %vm666_vm4, %v665_v46, %v647_v56 }
 0x7e3   :  { %v669_v16 = vsel %vm668_vm5, %v667_v15, %v650_v14 }
 0x7e5   :  { %v653_v24 = vpop.permute.xlu1 %652 }
 0x7e6   :  { %v671_v17 = vsel %vm670_vm6, %v669_v16, %v653_v24 }
 0x7e7   :  { %v673_v20 = vsel %vm672_vm7, %v671_v17, %v656_v1 }
 0x854   :  { %v660_v21 = vpop.permute.xlu1 %659 }
 0x855   :  { %v675_v23 = vsel %vm674_vm8, %v673_v20, %v660_v21 }
 0x856   :  { %v677_v25 = vsel %vm676_vm9, %v675_v23, 0.0 }
 0x857   :  { %678 = vst [vmem:[%s1035_s3] sm:$0xff] %v677_v25 }

</bundles_post_ra>
